<compile_context>
chip_gen: v6e
topology: v6e:2x2x1
jax: 0.10.0
libtpu: 0.0.40
codegen_flags: <defaults>
</compile_context>

<pallas_src>
import math
from functools import partial

import jax
import jax.numpy as jnp
from jax.experimental import pallas as pl
from jax.experimental.pallas import tpu as pltpu


_SQRT_2_OVER_PI = math.sqrt(2.0 / math.pi)


def _gelu_kernel(x_ref, o_ref):
    x = x_ref[...]
    xf = x.astype(jnp.float32)            # f32 internal math (matches PyTorch)
    x2 = xf * xf
    inner = _SQRT_2_OVER_PI * (xf + 0.044715 * (xf * x2))
    o_ref[...] = (0.5 * xf * (1.0 + jnp.tanh(inner))).astype(o_ref.dtype)


def _default_tile_bytes() -> int:
    """Generation-aware tile size for this HBM-bound elementwise kernel."""
    try:
        kind = jax.devices()[0].device_kind.lower()
    except Exception:
        kind = ""
    if "v7" in kind or "7x" in kind:
        # v7x: bigger tiles amortize per-step overhead against 3.2 TB/s HBM.
        # 4 buffers x 4 MiB = 16 MiB, under the 32 MiB default scoped VMEM,
        # so no vmem_limit_bytes override is needed.
        return 4 * 1024 * 1024
    # v5e/v6e: ~2 MiB already sits at the roofline knee; 8 MiB of pipeline
    # buffers stays comfortably under v5e's 16 MiB default scoped VMEM.
    return 2 * 1024 * 1024


def _cost(n_elems: int, itemsize: int) -> pl.CostEstimate:
    # ~8 VALU ops + 1 EUP tanh per element; traffic = read + write.
    return pl.CostEstimate(
        flops=8 * n_elems,
        transcendentals=n_elems,
        bytes_accessed=2 * n_elems * itemsize,
    )


@partial(jax.jit, static_argnames=("target_tile_bytes",))
def gelu_pallas(x: jax.Array, *, target_tile_bytes=None) -> jax.Array:
    """Elementwise tanh-GELU, matching the PyTorch module exactly."""
    orig_shape = x.shape
    dtype = x.dtype
    n = x.size
    if n == 0:
        return x
    if target_tile_bytes is None:
        target_tile_bytes = _default_tile_bytes()

    itemsize = jnp.dtype(dtype).itemsize
    x_flat = x.reshape(-1)  # free

    if n % 128 != 0:
        # Ragged path: zero-copy 1-D kernel over the flat array (no jnp.pad /
        # slice round trips).  Blocks are multiples of 1024 elements (full
        # vregs); the partial edge block is masked by Pallas, which is safe
        # for a pure elementwise op (garbage lanes never reach valid outputs).
        block = max(1024, ((target_tile_bytes // itemsize) // 1024) * 1024)
        if block >= n:
            block = n  # full-extent 1-D block: always a valid block shape
        out_flat = pl.pallas_call(
            _gelu_kernel,
            out_shape=jax.ShapeDtypeStruct((n,), dtype),
            grid_spec=pltpu.PrefetchScalarGridSpec(
                num_scalar_prefetch=0,
                grid=(pl.cdiv(n, block),),
                in_specs=[pl.BlockSpec((block,), lambda i: (i,))],
                out_specs=pl.BlockSpec((block,), lambda i: (i,)),
            ),
            compiler_params=pltpu.CompilerParams(
                dimension_semantics=("parallel",),
            ),
            cost_estimate=_cost(n, itemsize),
        )(x_flat)
        return out_flat.reshape(orig_shape)

    # Common path (numel % 128 == 0): lane-dense 2-D tiles, zero copies.
    cols = 128
    for c in (2048, 1024, 512, 256, 128):
        if n % c == 0:
            cols = c
            break
    rows = n // cols
    x2d = x_flat.reshape(rows, cols)  # free

    # Sublane packing: rows pack in pairs (bf16/fp16) / quads (int8/fp8).
    sub = 8 * max(1, 4 // itemsize)
    block_rows = max(sub, ((target_tile_bytes // (cols * itemsize)) // sub) * sub)
    if block_rows >= rows:
        block_rows = rows  # full row extent: always a valid block shape

    # Never collapse to a single grid step for non-tiny arrays: >= 2 steps lets
    # the "parallel" axis shard across both v7x TensorCores.
    total_bytes = n * itemsize
    if block_rows == rows and total_bytes > (1 << 20) and rows > sub:
        half = -(-rows // 2)                      # cdiv(rows, 2)
        block_rows = min(rows, (-(-half // sub)) * sub)

    grid = (pl.cdiv(rows, block_rows),)
    out2d = pl.pallas_call(
        _gelu_kernel,
        out_shape=jax.ShapeDtypeStruct((rows, cols), dtype),
        grid_spec=pltpu.PrefetchScalarGridSpec(
            num_scalar_prefetch=0,
            grid=grid,
            in_specs=[pl.BlockSpec((block_rows, cols), lambda i: (i, 0))],
            out_specs=pl.BlockSpec((block_rows, cols), lambda i: (i, 0)),
        ),
        compiler_params=pltpu.CompilerParams(
            dimension_semantics=("parallel",),
        ),
        cost_estimate=_cost(n, itemsize),
    )(x2d)
    return out2d.reshape(orig_shape)


if __name__ == "__main__":
    key = jax.random.PRNGKey(0)
    # Small NCHW-style input consistent with a typical activation use site.
    x = jax.random.normal(key, (2, 4, 16, 16), dtype=jnp.float32)

    out = gelu_pallas(x)
    jax.block_until_ready(out)

    # Sanity-check against a plain-JAX reference of the exact PyTorch formula.
    ref = 0.5 * x * (1.0 + jnp.tanh(_SQRT_2_OVER_PI * (x + 0.044715 * x**3)))
    assert out.shape == x.shape and out.dtype == x.dtype
    assert jnp.max(jnp.abs(out - ref)) < 1e-5

    # Ragged numel (not a multiple of 128) exercises the zero-copy 1-D path.
    x2 = jax.random.normal(jax.random.PRNGKey(0), (3, 5, 7, 11), dtype=jnp.float32)
    out2 = gelu_pallas(x2)
    jax.block_until_ready(out2)
    ref2 = 0.5 * x2 * (1.0 + jnp.tanh(_SQRT_2_OVER_PI * (x2 + 0.044715 * x2**3)))
    assert out2.shape == x2.shape and out2.dtype == x2.dtype
    assert jnp.max(jnp.abs(out2 - ref2)) < 1e-5

    print("KERNEL_OK")
</pallas_src>

<mosaic_0001>
module attributes {stable_mosaic.version = 11 : i64} {
  func.func @_gelu_kernel(%arg0: i32, %arg1: memref<1x2048xf32, #tpu.memory_space<vmem>>, %arg2: memref<1x2048xf32, #tpu.memory_space<vmem>>) attributes {dimension_semantics = [#tpu.dimension_semantics<parallel>], iteration_bounds = array<i64: 1>, scalar_prefetch = 0 : i64, scratch_operands = 0 : i64, tpu.core_type = #tpu.core_type<tc>, window_params = [{transform_indices = @transform_0, window_bounds = array<i64: 1, 2048>}, {transform_indices = @transform_1, window_bounds = array<i64: 1, 2048>}]} {
    %c0 = arith.constant 0 : index
    %c0_0 = arith.constant 0 : index
    %0 = vector.load %arg1[%c0, %c0_0] : memref<1x2048xf32, #tpu.memory_space<vmem>>, vector<1x2048xf32>
    %1 = arith.mulf %0, %0 : vector<1x2048xf32>
    %2 = arith.mulf %0, %1 : vector<1x2048xf32>
    %cst = arith.constant 4.471500e-02 : f32
    %3 = vector.broadcast %cst : f32 to vector<1x2048xf32>
    %4 = arith.mulf %3, %2 : vector<1x2048xf32>
    %5 = arith.addf %0, %4 : vector<1x2048xf32>
    %cst_1 = arith.constant 0.797884583 : f32
    %6 = vector.broadcast %cst_1 : f32 to vector<1x2048xf32>
    %7 = arith.mulf %6, %5 : vector<1x2048xf32>
    %cst_2 = arith.constant 5.000000e-01 : f32
    %8 = vector.broadcast %cst_2 : f32 to vector<1x2048xf32>
    %9 = arith.mulf %8, %0 : vector<1x2048xf32>
    %10 = math.tanh %7 : vector<1x2048xf32>
    %cst_3 = arith.constant 1.000000e+00 : f32
    %11 = vector.broadcast %cst_3 : f32 to vector<1x2048xf32>
    %12 = arith.addf %11, %10 : vector<1x2048xf32>
    %13 = arith.mulf %9, %12 : vector<1x2048xf32>
    %c0_4 = arith.constant 0 : index
    %c0_5 = arith.constant 0 : index
    %14 = vector.load %arg2[%c0_4, %c0_5] : memref<1x2048xf32, #tpu.memory_space<vmem>>, vector<1x2048xf32>
    tpu.vector_store %arg2[%c0_4, %c0_5], %13 {strides = array<i32>} : memref<1x2048xf32, #tpu.memory_space<vmem>>, vector<1x2048xf32>,
    return
  }
  func.func @transform_0(%arg0: i32) -> (i32, i32) {
    %c0_i32 = arith.constant 0 : i32
    %c0_i32_0 = arith.constant 0 : i32
    return %arg0, %c0_i32 : i32, i32
  }
  func.func @transform_1(%arg0: i32) -> (i32, i32) {
    %c0_i32 = arith.constant 0 : i32
    %c0_i32_0 = arith.constant 0 : i32
    return %arg0, %c0_i32 : i32, i32
  }
}

</mosaic_0001>

<bundles_post_ra>
// kernel: gelu_pallas.1
= control target key start
LH: loop header
LB: loop body
LE: loop exit
PB: predicated region body
PF: predicated region fallthrough
CT: control target
= control target key end

     0   :  { %s60_s0 = inlined_call_operand.vmem [shape: f32[1,2048], index: 0, kind: input, shape index: {}]   ;;  %s61_s1 = inlined_call_operand.vmem [shape: f32[1,2048], index: 1, kind: output, shape index: {}]  }
   0x1   :  { %v8_v0 = vld [vmem:[%s60_s0] sm:$0xff]  ;;  %v9_v1 = vld [vmem:[%s60_s0 + $0x8] sm:$0xff] }
   0x2   :  { %v10_v2 = vmul.f32 %v8_v0, %v8_v0  ;;  %v11_v3 = vmul.f32 %v9_v1, %v9_v1  ;;  %v20_v12 = vmul.f32 0.5, %v8_v0  ;;  %v21_v14 = vmul.f32 0.5, %v9_v1 }
   0x4   :  { %v12_v4 = vmul.f32 %v10_v2, %v8_v0  ;;  %v13_v5 = vmul.f32 %v11_v3, %v9_v1 }
   0x6   :  { %v14_v6 = vmul.f32 0.044715, %v12_v4  ;;  %v15_v7 = vmul.f32 0.044715, %v13_v5 }
   0x8   :  { %v16_v8 = vadd.f32 %v14_v6, %v8_v0  ;;  %v17_v9 = vadd.f32 %v15_v7, %v9_v1 }
   0xa   :  { %v18_v10 = vmul.f32 0.7978846, %v16_v8  ;;  %v19_v11 = vmul.f32 0.7978846, %v17_v9 }
   0xc   :  { %34 = vtanh.f32 %v18_v10 }
   0xd   :  { %36 = vtanh.f32 %v19_v11 }
  0x19   :  { %v35_v13 = vpop.eup %34 }
  0x1a   :  { %v37_v15 = vpop.eup %36  ;;  %v24_v16 = vadd.f32 1.0, %v35_v13 }
  0x1b   :  { %v25_v17 = vadd.f32 1.0, %v37_v15 }
  0x1c   :  { %v26_v18 = vmul.f32 %v24_v16, %v20_v12 }
  0x1d   :  { %v27_v19 = vmul.f32 %v25_v17, %v21_v14 }
  0x1e   :  { %28 = vst [vmem:[%s61_s1] sm:$0xff] %v26_v18 }
  0x1f   :  { %29 = vst [vmem:[%s61_s1 + $0x8] sm:$0xff] %v27_v19 }

</bundles_post_ra>
